<compile_context>
chip_gen: v7x
topology: tpu7x:2x2x1
jax: 0.10.0
libtpu: 0.0.40
codegen_flags: <defaults>
</compile_context>

<pallas_src>
import math

import jax
import jax.numpy as jnp
from jax import lax
from jax.experimental import pallas as pl
from jax.experimental.pallas import tpu as pltpu


# ----------------------------------------------------------------------------
# small helpers
# ----------------------------------------------------------------------------

def _round_up(x, m):
    return (x + m - 1) // m * m


def _pick_tile(dim, target):
    """If dim <= target use the full dim (always legal); else tile = target."""
    if dim <= target:
        return dim, dim
    return target, _round_up(dim, target)


def _pad_to(a, shape):
    if tuple(a.shape) == tuple(shape):
        return a
    pads = [(0, s - d) for d, s in zip(a.shape, shape)]
    return jnp.pad(a, pads)


def _vmem_limit(buffer_bytes):
    """Per-buffer sum + ~25% headroom; >=32MB (scoped default), <=64MB (v7x)."""
    need = int(buffer_bytes * 1.25) + (2 << 20)
    return max(32 * 1024 * 1024, min(need, 64 * 1024 * 1024))


# ----------------------------------------------------------------------------
# Tiled linear kernel:  y = x @ W + b      (inputs pre-staged at compute dtype)
# ----------------------------------------------------------------------------

def _linear_kernel(x_ref, w_ref, b_ref, o_ref, acc_ref):
    k = pl.program_id(2)

    @pl.when(k == 0)
    def _init():
        acc_ref[...] = jnp.zeros_like(acc_ref)

    acc_ref[...] += jnp.dot(x_ref[...], w_ref[...],
                            preferred_element_type=jnp.float32)

    @pl.when(k == pl.num_programs(2) - 1)
    def _finalize():
        o_ref[...] = (acc_ref[...] + b_ref[...]).astype(o_ref.dtype)


def pallas_linear(x, w, b, *, tm=256, tn=512, tk=512,
                  compute_dtype=jnp.float32, out_dtype=None):
    """x: (M, K), w: (K, N), b: (N,) -> (M, N). Tiled + pipelined."""
    out_dtype = out_dtype or x.dtype
    M, K = x.shape
    K2, N = w.shape
    assert K == K2

    # Stage MXU inputs at compute_dtype *before* the pallas_call so HBM DMA and
    # VMEM blocks are at that width (accumulation stays f32 inside).
    x = jnp.asarray(x, compute_dtype)
    w = jnp.asarray(w, compute_dtype)
    b = jnp.asarray(b, jnp.float32)

    tm, Mp = _pick_tile(M, tm)
    tn, Np = _pick_tile(N, tn)   # N <= 512 -> full N, j axis collapses
    tk, Kp = _pick_tile(K, tk)   # K <= 512 -> full K

    xp = _pad_to(x, (Mp, Kp))
    wp = _pad_to(w, (Kp, Np))
    bp = _pad_to(b.reshape(1, N), (1, Np))

    isz = jnp.dtype(compute_dtype).itemsize
    osz = jnp.dtype(out_dtype).itemsize
    buf_bytes = (2 * tm * tk * isz       # x, double-buffered
                 + 2 * tk * tn * isz     # w, double-buffered
                 + 2 * tn * 4            # bias
                 + 2 * tm * tn * osz     # output
                 + tm * tn * 4)          # f32 accumulator scratch

    out = pl.pallas_call(
        _linear_kernel,
        out_shape=jax.ShapeDtypeStruct((Mp, Np), out_dtype),
        grid_spec=pltpu.PrefetchScalarGridSpec(
            num_scalar_prefetch=0,
            grid=(Mp // tm, Np // tn, Kp // tk),
            in_specs=[
                pl.BlockSpec((tm, tk), lambda i, j, k: (i, k)),
                pl.BlockSpec((tk, tn), lambda i, j, k: (k, j)),
                pl.BlockSpec((1, tn), lambda i, j, k: (0, j)),
            ],
            out_specs=pl.BlockSpec((tm, tn), lambda i, j, k: (i, j)),
            scratch_shapes=[pltpu.VMEM((tm, tn), jnp.float32)],
        ),
        compiler_params=pltpu.CompilerParams(
            dimension_semantics=("parallel", "parallel", "arbitrary"),
            vmem_limit_bytes=_vmem_limit(buf_bytes),
        ),
        cost_estimate=pl.CostEstimate(
            flops=2 * M * N * K,
            transcendentals=0,
            bytes_accessed=isz * (M * K + K * N) + osz * M * N + 4 * N,
        ),
    )(xp, wp, bp)

    if (Mp, Np) != (M, N):
        out = out[:M, :N]
    return out


# ----------------------------------------------------------------------------
# Attention kernel: lane-dense (L, H*E) layout, online softmax over S tiles
# ----------------------------------------------------------------------------

def _make_attention_kernel(n_heads, d_keys, d_values, scale, s_valid, ts,
                           compute_dtype):
    def kernel(q_ref, k_ref, v_ref, o_ref, m_ref, l_ref, acc_ref):
        kv = pl.program_id(2)

        @pl.when(kv == 0)
        def _init():
            m_ref[...] = jnp.full_like(m_ref, -1e30)
            l_ref[...] = jnp.zeros_like(l_ref)
            acc_ref[...] = jnp.zeros_like(acc_ref)

        # Fold 1/sqrt(d_keys) into q once per block (one (tl, H*dk) VPU mul).
        q = q_ref[0] * scale          # (tl, H*dk), compute dtype
        k = k_ref[0]                  # (ts, H*dk)
        v = v_ref[0]                  # (ts, H*dv)

        # Key-padding mask (only generated when S was padded to a ts multiple).
        if (s_valid % ts) != 0:
            col = kv * ts + lax.broadcasted_iota(jnp.int32, (1, ts), 1)
            s_bias = jnp.where(col < s_valid, 0.0, -1e30).astype(jnp.float32)
        else:
            s_bias = None

        for h in range(n_heads):      # static unroll over heads
            hk = slice(h * d_keys, (h + 1) * d_keys)
            hv = slice(h * d_values, (h + 1) * d_values)
            qh = q[:, hk]
            kh = k[:, hk]
            vh = v[:, hv]
            # Contract on E directly (no explicit transpose / XLU work).
            s = lax.dot_general(qh, kh, (((1,), (1,)), ((), ())),
                                preferred_element_type=jnp.float32)  # (tl, ts)
            if s_bias is not None:
                s = s + s_bias
            m_prev = m_ref[:, h:h + 1]                                # (tl, 1)
            m_new = jnp.maximum(m_prev, jnp.max(s, axis=-1, keepdims=True))
            alpha = jnp.exp(m_prev - m_new)                           # (tl, 1)
            p = jnp.exp(s - m_new)                                    # (tl, ts)
            l_ref[:, h:h + 1] = alpha * l_ref[:, h:h + 1] + jnp.sum(
                p, axis=-1, keepdims=True)
            pv = lax.dot_general(p.astype(compute_dtype), vh,
                                 (((1,), (0,)), ((), ())),
                                 preferred_element_type=jnp.float32)  # (tl, dv)
            acc_ref[:, hv] = alpha * acc_ref[:, hv] + pv
            m_ref[:, h:h + 1] = m_new

        @pl.when(kv == pl.num_programs(2) - 1)
        def _finalize():
            # Fold the softmax denominator into the (tl, dv) head outputs
            # (S/dv fewer VPU multiplies than scaling p); EUP reciprocal.
            inv_l = pl.reciprocal(l_ref[...], approx=True)            # (tl, H)
            for h in range(n_heads):
                hv = slice(h * d_values, (h + 1) * d_values)
                acc_ref[:, hv] = acc_ref[:, hv] * inv_l[:, h:h + 1]
            # Single lane-dense store of all heads.
            o_ref[0] = acc_ref[...].astype(o_ref.dtype)

    return kernel


def pallas_attention(q, k, v, *, n_heads, d_keys, d_values, tl=256, ts=512,
                     compute_dtype=jnp.float32, out_dtype=None):
    """q: (B, L, H*dk), k: (B, S, H*dk), v: (B, S, H*dv) -> (B, L, H*dv)."""
    out_dtype = out_dtype or q.dtype
    B, L, HDk = q.shape
    _, S, _ = k.shape
    HDv = n_heads * d_values
    scale = 1.0 / math.sqrt(d_keys)

    q = jnp.asarray(q, compute_dtype)
    k = jnp.asarray(k, compute_dtype)
    v = jnp.asarray(v, compute_dtype)

    tl, Lp = _pick_tile(L, tl)
    ts, Sp = _pick_tile(S, ts)
    qp = _pad_to(q, (B, Lp, HDk))
    kp = _pad_to(k, (B, Sp, HDk))
    vp = _pad_to(v, (B, Sp, HDv))

    n_lt = Lp // tl
    n_kv = Sp // ts

    # Lead the grid with the larger parallel axis so both v7x TCs get work.
    if n_lt >= B:
        grid = (n_lt, B, n_kv)
        q_map = lambda lt, b, kv: (b, lt, 0)
        kv_map = lambda lt, b, kv: (b, kv, 0)
    else:
        grid = (B, n_lt, n_kv)
        q_map = lambda b, lt, kv: (b, lt, 0)
        kv_map = lambda b, lt, kv: (b, kv, 0)

    isz = jnp.dtype(compute_dtype).itemsize
    osz = jnp.dtype(out_dtype).itemsize
    buf_bytes = (2 * tl * HDk * isz            # q block, double-buffered
                 + 2 * ts * HDk * isz          # k tile
                 + 2 * ts * HDv * isz          # v tile
                 + 2 * tl * HDv * osz          # output block
                 + 2 * tl * 128 * 4            # m, l scratch (lane-padded)
                 + tl * _round_up(HDv, 128) * 4  # acc scratch
                 + 4 * tl * ts * 4)            # per-head s/p f32 temporaries

    out = pl.pallas_call(
        _make_attention_kernel(n_heads, d_keys, d_values, scale, S, ts,
                               compute_dtype),
        out_shape=jax.ShapeDtypeStruct((B, Lp, HDv), out_dtype),
        grid_spec=pltpu.PrefetchScalarGridSpec(
            num_scalar_prefetch=0,
            grid=grid,
            in_specs=[
                pl.BlockSpec((1, tl, HDk), q_map),
                pl.BlockSpec((1, ts, HDk), kv_map),
                pl.BlockSpec((1, ts, HDv), kv_map),
            ],
            out_specs=pl.BlockSpec((1, tl, HDv), q_map),
            scratch_shapes=[
                pltpu.VMEM((tl, n_heads), jnp.float32),  # running row max
                pltpu.VMEM((tl, n_heads), jnp.float32),  # running denom
                pltpu.VMEM((tl, HDv), jnp.float32),      # running output acc
            ],
        ),
        compiler_params=pltpu.CompilerParams(
            dimension_semantics=("parallel", "parallel", "arbitrary"),
            vmem_limit_bytes=_vmem_limit(buf_bytes),
        ),
        cost_estimate=pl.CostEstimate(
            flops=2 * B * n_heads * L * S * (d_keys + d_values),
            transcendentals=B * n_heads * L * S,
            bytes_accessed=isz * B * (L * HDk + S * (HDk + HDv))
            + osz * B * L * HDv,
        ),
    )(qp, kp, vp)

    if Lp != L:
        out = out[:, :L, :]
    return out


# ----------------------------------------------------------------------------
# AttentionLayer params / forward
# ----------------------------------------------------------------------------

def init_attention_layer_params(key, d_model, n_heads, d_keys=None, d_values=None):
    d_keys = d_keys or d_model // n_heads
    d_values = d_values or d_model // n_heads
    ks = jax.random.split(key, 8)

    def linear_init(kw, kb, fan_in, fan_out):
        # PyTorch nn.Linear default init: U(-1/sqrt(fan_in), 1/sqrt(fan_in))
        bound = 1.0 / math.sqrt(fan_in)
        w = jax.random.uniform(kw, (fan_in, fan_out), jnp.float32, -bound, bound)
        b = jax.random.uniform(kb, (fan_out,), jnp.float32, -bound, bound)
        return w, b

    p = {}
    p["q_w"], p["q_b"] = linear_init(ks[0], ks[1], d_model, d_keys * n_heads)
    p["k_w"], p["k_b"] = linear_init(ks[2], ks[3], d_model, d_keys * n_heads)
    p["v_w"], p["v_b"] = linear_init(ks[4], ks[5], d_model, d_values * n_heads)
    p["o_w"], p["o_b"] = linear_init(ks[6], ks[7], d_values * n_heads, d_model)
    p["n_heads"] = n_heads
    p["d_keys"] = d_keys
    p["d_values"] = d_values
    return p


def prepare_params(params, compute_dtype):
    """Pre-pack kernel-ready weights ONCE: QKV concat + cast to compute dtype."""
    cd = compute_dtype
    return {
        "n_heads": params["n_heads"],
        "d_keys": params["d_keys"],
        "d_values": params["d_values"],
        "compute_dtype": jnp.dtype(cd),
        # Fused self-attention projection: y = x @ [q_w | k_w | v_w]
        "qkv_w": jnp.asarray(jnp.concatenate(
            [params["q_w"], params["k_w"], params["v_w"]], axis=1), cd),
        "qkv_b": jnp.concatenate(
            [params["q_b"], params["k_b"], params["v_b"]]).astype(jnp.float32),
        "q_w": jnp.asarray(params["q_w"], cd),
        "k_w": jnp.asarray(params["k_w"], cd),
        "v_w": jnp.asarray(params["v_w"], cd),
        "o_w": jnp.asarray(params["o_w"], cd),
        "q_b": params["q_b"].astype(jnp.float32),
        "k_b": params["k_b"].astype(jnp.float32),
        "v_b": params["v_b"].astype(jnp.float32),
        "o_b": params["o_b"].astype(jnp.float32),
    }


def attention_layer_forward(params, queries, keys, values, *,
                            compute_dtype=jnp.bfloat16, prepared=None):
    if prepared is None or prepared["compute_dtype"] != jnp.dtype(compute_dtype):
        prepared = prepare_params(params, compute_dtype)
    B, L, d_model = queries.shape
    _, S, _ = keys.shape
    H = prepared["n_heads"]
    dk = prepared["d_keys"]
    dv = prepared["d_values"]
    cd = compute_dtype
    out_dtype = queries.dtype

    if queries is keys and keys is values:
        # Self-attention: weight-concat fused QKV (activation read once).
        x2d = queries.reshape(B * L, d_model)
        qkv = pallas_linear(x2d, prepared["qkv_w"], prepared["qkv_b"],
                            compute_dtype=cd, out_dtype=cd)
        q = qkv[:, :H * dk].reshape(B, L, H * dk)
        k = qkv[:, H * dk:2 * H * dk].reshape(B, S, H * dk)
        v = qkv[:, 2 * H * dk:2 * H * dk + H * dv].reshape(B, S, H * dv)
    else:
        q = pallas_linear(queries.reshape(B * L, d_model), prepared["q_w"],
                          prepared["q_b"], compute_dtype=cd,
                          out_dtype=cd).reshape(B, L, H * dk)
        k = pallas_linear(keys.reshape(B * S, d_model), prepared["k_w"],
                          prepared["k_b"], compute_dtype=cd,
                          out_dtype=cd).reshape(B, S, H * dk)
        v = pallas_linear(values.reshape(B * S, d_model), prepared["v_w"],
                          prepared["v_b"], compute_dtype=cd,
                          out_dtype=cd).reshape(B, S, H * dv)

    # Inner FullAttention: lane-dense (B, L, H*dv), online softmax over S tiles.
    out = pallas_attention(q, k, v, n_heads=H, d_keys=dk, d_values=dv,
                           compute_dtype=cd, out_dtype=cd)

    # Output projection back to d_model at the caller's dtype.
    out = pallas_linear(out.reshape(B * L, H * dv), prepared["o_w"],
                        prepared["o_b"], compute_dtype=cd, out_dtype=out_dtype)
    return out.reshape(B, L, d_model)


# ----------------------------------------------------------------------------
# Pure-JAX reference for correctness check
# ----------------------------------------------------------------------------

def reference_forward(params, queries, keys, values):
    B, L, d_model = queries.shape
    H = params["n_heads"]
    dk = params["d_keys"]
    dv = params["d_values"]
    q = (queries @ params["q_w"] + params["q_b"]).reshape(B, L, H, dk)
    k = (keys @ params["k_w"] + params["k_b"]).reshape(B, -1, H, dk)
    v = (values @ params["v_w"] + params["v_b"]).reshape(B, -1, H, dv)
    scale = 1.0 / math.sqrt(dk)
    s = jnp.einsum("blhe,bshe->bhls", q, k) * scale
    a = jax.nn.softmax(s, axis=-1)
    o = jnp.einsum("bhls,bshd->blhd", a, v).reshape(B, L, H * dv)
    return o @ params["o_w"] + params["o_b"]


# ----------------------------------------------------------------------------
# Main
# ----------------------------------------------------------------------------

if __name__ == "__main__":
    B, L, d_model, n_heads = 2, 8, 32, 4

    key = jax.random.PRNGKey(0)
    kq, kk, kv_, kp = jax.random.split(key, 4)
    queries = jax.random.normal(kq, (B, L, d_model), jnp.float32)
    keys_in = jax.random.normal(kk, (B, L, d_model), jnp.float32)
    values = jax.random.normal(kv_, (B, L, d_model), jnp.float32)

    params = init_attention_layer_params(kp, d_model, n_heads)

    # Cross-style path (distinct q/k/v inputs -> separate projection kernels).
    ref = reference_forward(params, queries, keys_in, values)
    prep_f32 = prepare_params(params, jnp.float32)
    out = attention_layer_forward(params, queries, keys_in, values,
                                  compute_dtype=jnp.float32, prepared=prep_f32)
    out = jax.block_until_ready(out)
    assert out.shape == (B, L, d_model)
    err_f32 = float(jnp.max(jnp.abs(out - ref)))
    assert err_f32 < 5e-3, f"f32 mismatch vs reference: {err_f32}"

    # Self-attention path (exercises the weight-concat fused QKV projection).
    ref_self = reference_forward(params, queries, queries, queries)
    out_self = attention_layer_forward(params, queries, queries, queries,
                                       compute_dtype=jnp.float32,
                                       prepared=prep_f32)
    out_self = jax.block_until_ready(out_self)
    err_self = float(jnp.max(jnp.abs(out_self - ref_self)))
    assert err_self < 5e-3, f"fused-QKV mismatch vs reference: {err_self}"

    # bf16 MXU staging (v6e/v7x fast path) with f32 accumulation: loose check.
    prep_bf16 = prepare_params(params, jnp.bfloat16)
    out_bf16 = attention_layer_forward(params, queries, keys_in, values,
                                       compute_dtype=jnp.bfloat16,
                                       prepared=prep_bf16)
    out_bf16 = jax.block_until_ready(out_bf16)
    err_bf16 = float(jnp.max(jnp.abs(out_bf16 - ref)))
    assert err_bf16 < 5e-2, f"bf16 mismatch vs reference: {err_bf16}"

    print("KERNEL_OK")
</pallas_src>

<mosaic_0001>
module attributes {stable_mosaic.version = 11 : i64} {
  func.func @_linear_kernel(%arg0: i32, %arg1: i32, %arg2: i32, %arg3: memref<16x32xf32, #tpu.memory_space<vmem>>, %arg4: memref<32x32xf32, #tpu.memory_space<vmem>>, %arg5: memref<1x32xf32, #tpu.memory_space<vmem>>, %arg6: memref<16x32xf32, #tpu.memory_space<vmem>>, %arg7: memref<16x32xf32, #tpu.memory_space<vmem>>) attributes {dimension_semantics = [#tpu.dimension_semantics<parallel>, #tpu.dimension_semantics<parallel>, #tpu.dimension_semantics<arbitrary>], iteration_bounds = array<i64: 1, 1, 1>, scalar_prefetch = 0 : i64, scratch_operands = 1 : i64, tpu.core_type = #tpu.core_type<tc>, window_params = [{transform_indices = @transform_0, window_bounds = array<i64: 16, 32>}, {transform_indices = @transform_1, window_bounds = array<i64: 32, 32>}, {transform_indices = @transform_2, window_bounds = array<i64: 1, 32>}, {transform_indices = @transform_3, window_bounds = array<i64: 16, 32>}]} {
    %c0_i32 = arith.constant 0 : i32
    %0 = arith.cmpi eq, %arg2, %c0_i32 : i32
    %1 = arith.extui %0 : i1 to i32
    %c0_i32_0 = arith.constant 0 : i32
    %2 = arith.cmpi ne, %1, %c0_i32_0 : i32
    scf.if %2 {
      %cst_10 = arith.constant 0.000000e+00 : f32
      %12 = vector.broadcast %cst_10 : f32 to vector<16x32xf32>
      %c0_11 = arith.constant 0 : index
      %c0_12 = arith.constant 0 : index
      %13 = vector.load %arg7[%c0_11, %c0_12] : memref<16x32xf32, #tpu.memory_space<vmem>>, vector<16x32xf32>
      tpu.vector_store %arg7[%c0_11, %c0_12], %12 {strides = array<i32>} : memref<16x32xf32, #tpu.memory_space<vmem>>, vector<16x32xf32>,
    } else {
    }
    %c0 = arith.constant 0 : index
    %c0_1 = arith.constant 0 : index
    %3 = vector.load %arg7[%c0, %c0_1] : memref<16x32xf32, #tpu.memory_space<vmem>>, vector<16x32xf32>
    %c0_2 = arith.constant 0 : index
    %c0_3 = arith.constant 0 : index
    %4 = vector.load %arg3[%c0_2, %c0_3] : memref<16x32xf32, #tpu.memory_space<vmem>>, vector<16x32xf32>
    %c0_4 = arith.constant 0 : index
    %c0_5 = arith.constant 0 : index
    %5 = vector.load %arg4[%c0_4, %c0_5] : memref<32x32xf32, #tpu.memory_space<vmem>>, vector<32x32xf32>
    %cst = arith.constant dense<0.000000e+00> : vector<16x32xf32>
    %6 = tpu.matmul %4, %5, %cst {dimension_numbers = #tpu.dot_dimension_numbers<[1], [0], [0], [1], [0, 0, 1, 1], [], []>} : vector<16x32xf32>, vector<32x32xf32>, vector<16x32xf32> -> vector<16x32xf32>
    %7 = arith.addf %3, %6 : vector<16x32xf32>
    %c0_6 = arith.constant 0 : index
    %c0_7 = arith.constant 0 : index
    %8 = vector.load %arg7[%c0_6, %c0_7] : memref<16x32xf32, #tpu.memory_space<vmem>>, vector<16x32xf32>
    tpu.vector_store %arg7[%c0_6, %c0_7], %7 {strides = array<i32>} : memref<16x32xf32, #tpu.memory_space<vmem>>, vector<16x32xf32>,
    %c0_i32_8 = arith.constant 0 : i32
    %9 = arith.cmpi eq, %arg2, %c0_i32_8 : i32
    %10 = arith.extui %9 : i1 to i32
    %c0_i32_9 = arith.constant 0 : i32
    %11 = arith.cmpi ne, %10, %c0_i32_9 : i32
    scf.if %11 {
      %c0_10 = arith.constant 0 : index
      %c0_11 = arith.constant 0 : index
      %12 = vector.load %arg7[%c0_10, %c0_11] : memref<16x32xf32, #tpu.memory_space<vmem>>, vector<16x32xf32>
      %c0_12 = arith.constant 0 : index
      %c0_13 = arith.constant 0 : index
      %13 = vector.load %arg5[%c0_12, %c0_13] : memref<1x32xf32, #tpu.memory_space<vmem>>, vector<1x32xf32>
      %14 = vector.broadcast %13 : vector<1x32xf32> to vector<16x32xf32>
      %15 = arith.addf %12, %14 : vector<16x32xf32>
      %c0_14 = arith.constant 0 : index
      %c0_15 = arith.constant 0 : index
      %16 = vector.load %arg6[%c0_14, %c0_15] : memref<16x32xf32, #tpu.memory_space<vmem>>, vector<16x32xf32>
      tpu.vector_store %arg6[%c0_14, %c0_15], %15 {strides = array<i32>} : memref<16x32xf32, #tpu.memory_space<vmem>>, vector<16x32xf32>,
    } else {
    }
    return
  }
  func.func @transform_0(%arg0: i32, %arg1: i32, %arg2: i32) -> (i32, i32) {
    %c0_i32 = arith.constant 0 : i32
    return %arg0, %arg2 : i32, i32
  }
  func.func @transform_1(%arg0: i32, %arg1: i32, %arg2: i32) -> (i32, i32) {
    %c0_i32 = arith.constant 0 : i32
    return %arg2, %arg1 : i32, i32
  }
  func.func @transform_2(%arg0: i32, %arg1: i32, %arg2: i32) -> (i32, i32) {
    %c0_i32 = arith.constant 0 : i32
    %c0_i32_0 = arith.constant 0 : i32
    return %c0_i32, %arg1 : i32, i32
  }
  func.func @transform_3(%arg0: i32, %arg1: i32, %arg2: i32) -> (i32, i32) {
    %c0_i32 = arith.constant 0 : i32
    return %arg0, %arg1 : i32, i32
  }
}

</mosaic_0001>

<bundles_post_ra>
// kernel: tpu_custom_call.1
= control target key start
LH: loop header
LB: loop body
LE: loop exit
PB: predicated region body
PF: predicated region fallthrough
CT: control target
= control target key end

     0   :  { %8 = vsyncpa [#allocation4], 0  ;;  %s366_s0 = inlined_call_operand.hbm [shape: f32[16,32], index: 0, kind: input, shape index: {}]   ;;  %s367_s1 = inlined_call_operand.hbm [shape: f32[32,32], index: 1, kind: input, shape index: {}]   ;;  %s368_s2 = inlined_call_operand.vmem [shape: f32[1,32], index: 2, kind: input, shape index: {}]   ;;  %s369_s3 = inlined_call_operand.hbm [shape: f32[16,32], index: 3, kind: output, shape index: {}]  }
   0x1   :  { %9 = vsyncpa [#allocation7], 0 }
   0x2   :  { %10 = vsyncpa [#allocation5], 0  ;;  %s284_s12 = smov [#allocation3]   ;;  %s212_s16 = scalar_lea.hbm %s366_s0, 256 }
   0x3   :  { %s16_s13 = sshll.u32 %s284_s12, 4  ;;  %p213_p0 = scmp.ne.s32.totalorder %s366_s0, %s212_s16  ;;  %s17_s13 = int_to_ptr.vmem [resolvable:$true] %s16_s13 }
   0x4   :  { %p216_p1 = scmp.lt.u32.totalorder %s212_s16, %s366_s0 }
   0x6   :  { %p218_p2 = pnand %p216_p1, %p213_p0 }
   0x8   :  { %221 = shalt.err (!%p218_p2)
}
   0x9   :  { %s222_s21 = scalar_lea.vmem %s17_s13, 256  ;;  %p227_p4 = scmp.lt.s32.totalorder %s17_s13, %s17_s13 }
   0xa   :  { %p223_p3 = scmp.ne.s32.totalorder %s17_s13, %s222_s21  ;;  %p228_p5 = scmp.lt.s32.totalorder %s222_s21, %s222_s21 }
   0xc   :  { %p229_p6 = por %p228_p5, %p227_p4 }
   0xe   :  { %p230_p7 = pnand %p229_p6, %p223_p3 }
  0x10   :  { %233 = shalt.err (!%p230_p7)
}
  0x11   :  { %s285_s22 = smov 128   ;;  %s286_s23 = smov 8  }
  0x12   :  { %22 = dma.hbm_to_vmem [thread:$0]  %s366_s0, 256, %s17_s13, [#allocation4], %s285_s22, %s285_s22, %s286_s23  }
  0x13   :  { %s287_s26 = smov [#allocation6]   ;;  %s234_s30 = scalar_lea.hbm %s367_s1, 512 }
  0x14   :  { %s28_s27 = sshll.u32 %s287_s26, 4  ;;  %p235_p8 = scmp.ne.s32.totalorder %s367_s1, %s234_s30  ;;  %s29_s27 = int_to_ptr.vmem [resolvable:$true] %s28_s27 }
  0x15   :  { %p238_p9 = scmp.lt.u32.totalorder %s234_s30, %s367_s1 }
  0x17   :  { %p240_p10 = pnand %p238_p9, %p235_p8 }
  0x19   :  { %243 = shalt.err (!%p240_p10)
}
  0x1a   :  { %s244_s8 = scalar_lea.vmem %s29_s27, 512  ;;  %p249_p12 = scmp.lt.s32.totalorder %s29_s27, %s29_s27 }
  0x1b   :  { %p245_p11 = scmp.ne.s32.totalorder %s29_s27, %s244_s8  ;;  %p250_p13 = scmp.lt.s32.totalorder %s244_s8, %s244_s8 }
  0x1d   :  { %p251_p0 = por %p250_p13, %p249_p12 }
  0x1f   :  { %p252_p1 = pnand %p251_p0, %p245_p11 }
  0x21   :  { %255 = shalt.err (!%p252_p1)
}
  0x22   :  { %34 = dma.hbm_to_vmem [thread:$0]  %s367_s1, 512, %s29_s27, [#allocation7], %s285_s22, %s285_s22, %s286_s23  }
  0x23   :  { %278 = dma.done.wait [#allocation4], 256  }
  0x24   :  { %279 = vsyncadd [#allocation4], 4294967040 }
  0x25   :  { %280 = dma.done.wait [#allocation7], 512  }
  0x26   :  { %281 = vsyncadd [#allocation7], 4294966784  ;;  %vm47_vm0 = vcmask 261120   ;;  %v288_v0 = vmov 0.0   ;;  %v54_v1 = vld [vmem:[#allocation6] sm:$0xff]  ;;  %v55_v2 = vld [vmem:[#allocation6 + $0x8] sm:$0xff] }
  0x27   :  { %49 = vst.msk [vmem:[#allocation2 + $0x8] sm:$0xff] %vm47_vm0, %v288_v0  ;;  %48 = vst.msk [vmem:[#allocation2] sm:$0xff] %vm47_vm0, %v288_v0  ;;  %v56_v3 = vld [vmem:[#allocation6 + $0x10] sm:$0xff]  ;;  %v198_v4 = vpack.c.bf16 %v55_v2, %v54_v1  ;;  %v57_v5 = vld [vmem:[#allocation6 + $0x18] sm:$0xff]  ;;  %s289_s11 = smov [#allocation8]  }
  0x28   :  { %v52_v6 = vld [vmem:[#allocation3] sm:$0xff]  ;;  %v202_v7 = vpack.c.bf16 %v57_v5, %v56_v3  ;;  %v53_v8 = vld [vmem:[#allocation3 + $0x8] sm:$0xff]  ;;  %v180_v15 = vld [vmem:[%s368_s2] ss:$0 sm:$0xff]  ;;  %s165_s12 = sshll.u32 %s289_s11, 4  ;;  %s166_s12 = int_to_ptr.vmem [resolvable:$true] %s165_s12 }
  0x29   :  { %195 = vmatprep.mubr.msk.f32.mxu0 %vm47_vm0, %v52_v6  ;;  %199 = vmatprep.subr.bf16.mxu0 %v198_v4  ;;  %s256_s13 = scalar_lea.vmem %s166_s12, 256  ;;  %p261_p3 = scmp.lt.s32.totalorder %s166_s12, %s166_s12 }
  0x2a   :  { %201 = vmatpush3.bf16.msra.mxu0 %v198_v4  ;;  %p257_p2 = scmp.ne.s32.totalorder %s166_s12, %s256_s13  ;;  %p262_p4 = scmp.lt.s32.totalorder %s256_s13, %s256_s13 }
  0x2b   :  { %203 = vmatprep.subr.bf16.mxu0 %v202_v7 }
  0x2c   :  { %p263_p5 = por %p262_p4, %p261_p3 }
  0x2e   :  { %205 = vmatpush3.bf16.msra.mxu0 %v202_v7  ;;  %v51_v9 = vld [vmem:[#allocation2 + $0x8] sm:$0xff]  ;;  %v50_v10 = vld [vmem:[#allocation2] sm:$0xff]  ;;  %p264_p6 = pnand %p263_p5, %p257_p2 }
  0x31   :  { %196 = vmatmul.mubr.msk.f32.vlgmr.msra.gmra.mrb[0].mxu0 %vm47_vm0, %v53_v8 }
 0x104   :  { %v197_v11 = vpop.f32.mrb[0].mxu0 }
 0x105   :  { %v141_v12 = vadd.f32 %v197_v11, %v51_v9  ;;  %v131_v13 = vpop.f32.mrb[1].mxu0 }
 0x106   :  { %v140_v14 = vadd.f32 %v131_v13, %v50_v10 }
 0x107   :  { %143 = vst.msk [vmem:[#allocation2 + $0x8] sm:$0xff] %vm47_vm0, %v141_v12 }
 0x108   :  { %142 = vst.msk [vmem:[#allocation2] sm:$0xff] %vm47_vm0, %v140_v14 }
 0x10e   :  { %v148_v16 = vld [vmem:[#allocation2 + $0x8] sm:$0xff] }
 0x10f   :  { %v147_v17 = vld [vmem:[#allocation2] sm:$0xff]  ;;  %v157_v18 = vadd.f32 %v180_v15, %v148_v16 }
 0x110   :  { %v156_v19 = vadd.f32 %v180_v15, %v147_v17 }
 0x111   :  { %159 = vst.msk [vmem:[#allocation8 + $0x8] sm:$0xff] %vm47_vm0, %v157_v18 }
 0x112   :  { %158 = vst.msk [vmem:[#allocation8] sm:$0xff] %vm47_vm0, %v156_v19 }
 0x113   :  { %267 = shalt.err (!%p264_p6)
}
 0x114   :  { %s268_s15 = scalar_lea.hbm %s369_s3, 256 }
 0x115   :  { %p269_p7 = scmp.ne.s32.totalorder %s369_s3, %s268_s15  ;;  %p272_p8 = scmp.lt.u32.totalorder %s268_s15, %s369_s3 }
 0x117   :  { %p274_p9 = pnand %p272_p8, %p269_p7 }
 0x119   :  { %277 = shalt.err (!%p274_p9)
}
 0x11a   :  { %171 = dma.vmem_to_hbm [thread:$0]  %s166_s12, 256, %s369_s3, [#allocation5], %s285_s22, %s285_s22, %s286_s23  }
 0x11b   :  { %282 = dma.done.wait [#allocation5], 256  }
 0x11c   :  { %283 = vsyncadd [#allocation5], 4294967040 }
 0x11d   :  { %175 = vsyncpa [#allocation4], 1 }
 0x11e   :  { %176 = vsyncpa [#allocation7], 1 }
 0x11f   :  { %177 = vsyncpa [#allocation5], 1 }

</bundles_post_ra>
